<compile_context>
chip_gen: v7x
topology: tpu7x:2x2x1
jax: 0.10.0
libtpu: 0.0.40
codegen_flags: <defaults>
</compile_context>

<pallas_src>
import jax
import jax.numpy as jnp
from jax import lax
from jax.experimental import pallas as pl
from jax.experimental.pallas import tpu as pltpu

OUT_FEATURES = 2
OUT_PAD = 128          # pad weight rows to one full MXU/lane tile (keep at 128, even on v6e/v7x)
LANE = 128
_F32 = 4               # bytes per element


def _round_down(v, m):
    return max(m, (v // m) * m)


def _round_up(v, m):
    return ((v + m - 1) // m) * m


# ---------------------------------------------------------------------------
# Kernels
# ---------------------------------------------------------------------------
def _linear_kernel_resident(x_ref, w_ref, b_ref, o_ref):
    """Full reduction in one step.  x:(TB,D)  w:(128,D)  b:(128,1)  o:(2,TB)."""
    acc = lax.dot_general(
        w_ref[...], x_ref[...],
        dimension_numbers=(((1,), (1,)), ((), ())),      # W @ x^T -> (128, TB), lane-dense
        preferred_element_type=jnp.float32)
    o_ref[...] = (acc[:OUT_FEATURES, :] + b_ref[:OUT_FEATURES, :]).astype(o_ref.dtype)


def _make_ktiled_kernel(tile_k, k_rem):
    """Wide-inp_dim variant: stream K slabs into a (128, TB) f32 accumulator."""

    def kernel(x_ref, w_ref, b_ref, o_ref, acc_ref):
        k = pl.program_id(1)
        nk = pl.num_programs(1)

        @pl.when(k == 0)
        def _():
            acc_ref[...] = jnp.zeros_like(acc_ref)

        x = x_ref[...]
        w = w_ref[...]
        if k_rem:  # static: D % tile_k != 0 -> zero the stale tail of the last slab
            valid = jnp.where(k == nk - 1, k_rem, tile_k)
            w = jnp.where(lax.broadcasted_iota(jnp.int32, w.shape, 1) < valid, w, 0.0)
            x = jnp.where(lax.broadcasted_iota(jnp.int32, x.shape, 1) < valid, x, 0.0)

        acc_ref[...] += lax.dot_general(
            w, x, dimension_numbers=(((1,), (1,)), ((), ())),
            preferred_element_type=jnp.float32)

        @pl.when(k == nk - 1)
        def _():
            o_ref[...] = (acc_ref[:OUT_FEATURES, :]
                          + b_ref[:OUT_FEATURES, :]).astype(o_ref.dtype)

    return kernel


# ---------------------------------------------------------------------------
# Tiling / VMEM budgeting
# ---------------------------------------------------------------------------
def _vmem_capacity_bytes():
    try:
        return int(pltpu.get_tpu_info().vmem_capacity_bytes)
    except Exception:
        return 64 << 20            # conservative default (v7x per-core VMEM)


def _choose_tiling(B, D):
    """Returns (tile_b, tile_k, vmem_limit_bytes)."""
    vmem_cap = _vmem_capacity_bytes()
    budget = int(vmem_cap * 0.70)  # headroom for Mosaic internal scratch
    misc = 256 << 10               # bias, semaphores, slack
    vmem_limit = min(int(vmem_cap * 0.90), 128 << 20)

    def footprint(tb, tk, w_bufs):
        return (2 * tb * tk * _F32                 # x tile, double buffered
                + w_bufs * OUT_PAD * tk * _F32     # weight
                + tb * OUT_PAD * _F32              # (128, tb) matmul result / accumulator
                + 2 * 8 * tb * _F32                # (2, tb) out tile (sublane padded), 2 bufs
                + misc)

    # ---- preferred: the whole (128, D) weight stays resident in VMEM ----
    if footprint(min(B, LANE), D, 1) <= budget:
        avail = budget - OUT_PAD * D * _F32 - misc
        per_row = (2 * D + OUT_PAD + 2 * 8) * _F32
        tb_fit = _round_down(avail // per_row, LANE)
        # ~4 MiB of streamed x per grid step amortizes the ~0.35us/step overhead
        tb_target = _round_down((4 << 20) // (D * _F32), LANE)
        tb = min(tb_fit, tb_target, 16384)
        if B < 2 * LANE:
            tile_b = B                                        # single full-batch block
        else:
            # guarantee >= 2 grid steps so both v7x TensorCores get work
            tile_b = min(tb, _round_up(pl.cdiv(B, 2), LANE))
        return tile_b, D, vmem_limit

    # ---- fallback: inp_dim too wide -> stream x and W over a K grid axis ----
    tile_b = B if B < 2 * LANE else 2 * LANE
    fixed = tile_b * OUT_PAD * _F32 + 2 * 8 * tile_b * _F32 + misc
    per_k = (2 * tile_b + 2 * OUT_PAD) * _F32                 # x + W per K column (2 bufs each)
    tk_fit = _round_down(max(budget - fixed, 0) // per_k, LANE)
    tk_target = _round_down((8 << 20) // (tile_b * _F32), LANE)  # <= ~8 MiB of x per step
    tile_k = min(max(LANE, min(tk_fit, tk_target)), _round_up(D, LANE))
    return tile_b, tile_k, vmem_limit


# ---------------------------------------------------------------------------
# pallas_call builder + wrapper
# ---------------------------------------------------------------------------
def _invariant_spec(shape, single_buffer):
    """BlockSpec for a grid-invariant operand (constant index_map)."""
    if single_buffer:
        return pl.BlockSpec(shape, lambda *_: (0,) * len(shape),
                            pipeline_mode=pl.Buffered(1))
    return pl.BlockSpec(shape, lambda *_: (0,) * len(shape))


def _build_call(B, D, tile_b, tile_k, vmem_limit, single_buffer_invariants):
    grid_b = pl.cdiv(B, tile_b)
    grid_k = pl.cdiv(D, tile_k)
    k_tiled = grid_k > 1

    cost = pl.CostEstimate(
        flops=2 * B * D * OUT_FEATURES,            # real logits, not the padded width
        transcendentals=0,
        bytes_accessed=(B * D + OUT_PAD * D + OUT_PAD + OUT_FEATURES * B) * _F32,
    )

    if not k_tiled:
        kernel = _linear_kernel_resident
        grid = (grid_b,)
        in_specs = [
            pl.BlockSpec((tile_b, D), lambda i: (i, 0)),                  # stream x
            _invariant_spec((OUT_PAD, D), single_buffer_invariants),      # resident W (padded rows)
            _invariant_spec((OUT_PAD, 1), single_buffer_invariants),      # resident bias
        ]
        out_specs = pl.BlockSpec((OUT_FEATURES, tile_b), lambda i: (0, i))
        scratch = []
        semantics = ("parallel",)
    else:
        kernel = _make_ktiled_kernel(tile_k, D % tile_k)
        grid = (grid_b, grid_k)                                           # reduction axis last
        in_specs = [
            pl.BlockSpec((tile_b, tile_k), lambda i, k: (i, k)),          # stream x
            pl.BlockSpec((OUT_PAD, tile_k), lambda i, k: (0, k)),         # stream W slabs
            _invariant_spec((OUT_PAD, 1), single_buffer_invariants),      # resident bias
        ]
        out_specs = pl.BlockSpec((OUT_FEATURES, tile_b), lambda i, k: (0, i))
        scratch = [pltpu.VMEM((OUT_PAD, tile_b), jnp.float32)]
        semantics = ("parallel", "arbitrary")

    return pl.pallas_call(
        kernel,
        out_shape=jax.ShapeDtypeStruct((OUT_FEATURES, B), jnp.float32),
        grid_spec=pltpu.PrefetchScalarGridSpec(
            num_scalar_prefetch=0,
            grid=grid,
            in_specs=in_specs,
            out_specs=out_specs,
            scratch_shapes=scratch,
        ),
        compiler_params=pltpu.CompilerParams(
            dimension_semantics=semantics,
            vmem_limit_bytes=vmem_limit,
        ),
        cost_estimate=cost,
    )


def linear_classifier_forward(x, w_pad, b_pad, *, tile_b=None, tile_k=None):
    """x: (B, D) f32; w_pad: (OUT_PAD, D) f32 (rows >= OUT_FEATURES are zero);
    b_pad: (OUT_PAD, 1) f32.  Returns (B, OUT_FEATURES) f32 logits."""
    B, D = x.shape
    auto_tb, auto_tk, vmem_limit = _choose_tiling(B, D)
    tile_b = auto_tb if tile_b is None else min(tile_b, B)
    tile_k = auto_tk if tile_k is None else min(tile_k, D)

    try:
        out_t = _build_call(B, D, tile_b, tile_k, vmem_limit, True)(x, w_pad, b_pad)
    except Exception:
        # pipeline_mode=pl.Buffered(1) not accepted on this jax version:
        # retry with default double-buffering of the invariant operands.
        out_t = _build_call(B, D, tile_b, tile_k, vmem_limit, False)(x, w_pad, b_pad)

    return out_t.T     # lane-dense (2, B) kernel output -> (B, 2) logits


def init_params(key, inp_dim):
    """Deterministic init mirroring nn.Linear's U(-1/sqrt(in), 1/sqrt(in))."""
    kw, kb = jax.random.split(key)
    bound = 1.0 / (inp_dim ** 0.5)
    w = jax.random.uniform(kw, (OUT_FEATURES, inp_dim), jnp.float32, -bound, bound)
    b = jax.random.uniform(kb, (OUT_FEATURES,), jnp.float32, -bound, bound)
    # Zero-pad weight rows / bias to one MXU tile (128) for the kernel layout.
    w_pad = jnp.zeros((OUT_PAD, inp_dim), jnp.float32).at[:OUT_FEATURES, :].set(w)
    b_pad = jnp.zeros((OUT_PAD, 1), jnp.float32).at[:OUT_FEATURES, 0].set(b)
    return w, b, w_pad, b_pad


if __name__ == "__main__":
    key = jax.random.PRNGKey(0)
    kx, kp, kx2, kp2 = jax.random.split(key, 4)

    # --- small-shape smoke test (resident-weight path, single K block) ---
    batch, inp_dim = 8, 32
    x = jax.random.normal(kx, (batch, inp_dim), jnp.float32)
    w, b, w_pad, b_pad = init_params(kp, inp_dim)
    out = jax.block_until_ready(linear_classifier_forward(x, w_pad, b_pad))
    ref = x @ w.T + b
    assert out.shape == (batch, OUT_FEATURES), out.shape
    assert jnp.allclose(out, ref, atol=1e-5, rtol=1e-5), "resident-path mismatch"

    # --- exercise the wide-inp_dim (K-tiled) fallback, incl. D % tile_k != 0 ---
    batch2, inp_dim2 = 16, 300
    x2 = jax.random.normal(kx2, (batch2, inp_dim2), jnp.float32)
    w2, b2, w2_pad, b2_pad = init_params(kp2, inp_dim2)
    out2 = jax.block_until_ready(
        linear_classifier_forward(x2, w2_pad, b2_pad, tile_k=128))
    ref2 = x2 @ w2.T + b2
    assert out2.shape == (batch2, OUT_FEATURES), out2.shape
    assert jnp.allclose(out2, ref2, atol=1e-4, rtol=1e-4), "k-tiled-path mismatch"

    print("KERNEL_OK")
</pallas_src>

<mosaic_0001>
module attributes {stable_mosaic.version = 11 : i64} {
  func.func @_linear_kernel_resident(%arg0: i32, %arg1: memref<8x32xf32, #tpu.memory_space<vmem>>, %arg2: memref<128x32xf32, #tpu.memory_space<vmem>>, %arg3: memref<128x1xf32, #tpu.memory_space<vmem>>, %arg4: memref<2x8xf32, #tpu.memory_space<vmem>>) attributes {dimension_semantics = [#tpu.dimension_semantics<parallel>], iteration_bounds = array<i64: 1>, scalar_prefetch = 0 : i64, scratch_operands = 0 : i64, tpu.core_type = #tpu.core_type<tc>, window_params = [{transform_indices = @transform_0, window_bounds = array<i64: 8, 32>}, {pipeline_mode = #tpu.pipeline_mode<synchronous>, transform_indices = @transform_1, window_bounds = array<i64: 128, 32>}, {pipeline_mode = #tpu.pipeline_mode<synchronous>, transform_indices = @transform_2, window_bounds = array<i64: 128, 1>}, {transform_indices = @transform_3, window_bounds = array<i64: 2, 8>}]} {
    %c0 = arith.constant 0 : index
    %c0_0 = arith.constant 0 : index
    %0 = vector.load %arg2[%c0, %c0_0] : memref<128x32xf32, #tpu.memory_space<vmem>>, vector<128x32xf32>
    %c0_1 = arith.constant 0 : index
    %c0_2 = arith.constant 0 : index
    %1 = vector.load %arg1[%c0_1, %c0_2] : memref<8x32xf32, #tpu.memory_space<vmem>>, vector<8x32xf32>
    %cst = arith.constant dense<0.000000e+00> : vector<128x8xf32>
    %2 = tpu.matmul %0, %1, %cst {dimension_numbers = #tpu.dot_dimension_numbers<[1], [1], [0], [0], [0, 0, 1, 0], [], []>} : vector<128x32xf32>, vector<8x32xf32>, vector<128x8xf32> -> vector<128x8xf32>
    %3 = vector.extract_strided_slice %2 {offsets = [0, 0], sizes = [2, 8], strides = [1, 1]} : vector<128x8xf32> to vector<2x8xf32>
    %c0_3 = arith.constant 0 : index
    %c0_4 = arith.constant 0 : index
    %4 = vector.load %arg3[%c0_3, %c0_4] : memref<128x1xf32, #tpu.memory_space<vmem>>, vector<2x1xf32>
    %5 = vector.broadcast %4 : vector<2x1xf32> to vector<2x8xf32>
    %6 = arith.addf %3, %5 : vector<2x8xf32>
    %c0_5 = arith.constant 0 : index
    %c0_6 = arith.constant 0 : index
    %7 = vector.load %arg4[%c0_5, %c0_6] : memref<2x8xf32, #tpu.memory_space<vmem>>, vector<2x8xf32>
    tpu.vector_store %arg4[%c0_5, %c0_6], %6 {strides = array<i32>} : memref<2x8xf32, #tpu.memory_space<vmem>>, vector<2x8xf32>,
    return
  }
  func.func @transform_0(%arg0: i32) -> (i32, i32) {
    %c0_i32 = arith.constant 0 : i32
    %c0_i32_0 = arith.constant 0 : i32
    return %arg0, %c0_i32 : i32, i32
  }
  func.func @transform_1(%arg0: i32) -> (i32, i32) {
    %c0_i32 = arith.constant 0 : i32
    %c0_i32_0 = arith.constant 0 : i32
    %c0_i32_1 = arith.constant 0 : i32
    return %c0_i32, %c0_i32_0 : i32, i32
  }
  func.func @transform_2(%arg0: i32) -> (i32, i32) {
    %c0_i32 = arith.constant 0 : i32
    %c0_i32_0 = arith.constant 0 : i32
    %c0_i32_1 = arith.constant 0 : i32
    return %c0_i32, %c0_i32_0 : i32, i32
  }
  func.func @transform_3(%arg0: i32) -> (i32, i32) {
    %c0_i32 = arith.constant 0 : i32
    %c0_i32_0 = arith.constant 0 : i32
    return %c0_i32, %arg0 : i32, i32
  }
}

module attributes {stable_mosaic.version = 11 : i64} {
  func.func @_linear_kernel_resident(%arg0: i32, %arg1: memref<8x32xf32, #tpu.memory_space<vmem>>, %arg2: memref<128x32xf32, #tpu.memory_space<vmem>>, %arg3: memref<128x1xf32, #tpu.memory_space<vmem>>, %arg4: memref<2x8xf32, #tpu.memory_space<vmem>>) attributes {dimension_semantics = [#tpu.dimension_semantics<parallel>], iteration_bounds = array<i64: 1>, scalar_prefetch = 0 : i64, scratch_operands = 0 : i64, tpu.core_type = #tpu.core_type<tc>, window_params = [{transform_indices = @transform_0, window_bounds = array<i64: 8, 32>}, {pipeline_mode = #tpu.pipeline_mode<synchronous>, transform_indices = @transform_1, window_bounds = array<i64: 128, 32>}, {pipeline_mode = #tpu.pipeline_mode<synchronous>, transform_indices = @transform_2, window_bounds = array<i64: 128, 1>}, {transform_indices = @transform_3, window_bounds = array<i64: 2, 8>}]} {
    %c0 = arith.constant 0 : index
    %c0_0 = arith.constant 0 : index
    %0 = vector.load %arg2[%c0, %c0_0] : memref<128x32xf32, #tpu.memory_space<vmem>>, vector<128x32xf32>
    %c0_1 = arith.constant 0 : index
    %c0_2 = arith.constant 0 : index
    %1 = vector.load %arg1[%c0_1, %c0_2] : memref<8x32xf32, #tpu.memory_space<vmem>>, vector<8x32xf32>
    %cst = arith.constant dense<0.000000e+00> : vector<128x8xf32>
    %2 = tpu.matmul %0, %1, %cst {dimension_numbers = #tpu.dot_dimension_numbers<[1], [1], [0], [0], [0, 0, 1, 0], [], []>} : vector<128x32xf32>, vector<8x32xf32>, vector<128x8xf32> -> vector<128x8xf32>
    %3 = vector.extract_strided_slice %2 {offsets = [0, 0], sizes = [2, 8], strides = [1, 1]} : vector<128x8xf32> to vector<2x8xf32>
    %c0_3 = arith.constant 0 : index
    %c0_4 = arith.constant 0 : index
    %4 = vector.load %arg3[%c0_3, %c0_4] : memref<128x1xf32, #tpu.memory_space<vmem>>, vector<2x1xf32>
    %5 = vector.broadcast %4 : vector<2x1xf32> to vector<2x8xf32>
    %6 = arith.addf %3, %5 : vector<2x8xf32>
    %c0_5 = arith.constant 0 : index
    %c0_6 = arith.constant 0 : index
    %7 = vector.load %arg4[%c0_5, %c0_6] : memref<2x8xf32, #tpu.memory_space<vmem>>, vector<2x8xf32>
    tpu.vector_store %arg4[%c0_5, %c0_6], %6 {strides = array<i32>} : memref<2x8xf32, #tpu.memory_space<vmem>>, vector<2x8xf32>,
    return
  }
  func.func @transform_0(%arg0: i32) -> (i32, i32) {
    %c0_i32 = arith.constant 0 : i32
    %c0_i32_0 = arith.constant 0 : i32
    return %arg0, %c0_i32 : i32, i32
  }
  func.func @transform_1(%arg0: i32) -> (i32, i32) {
    %c0_i32 = arith.constant 0 : i32
    %c0_i32_0 = arith.constant 0 : i32
    %c0_i32_1 = arith.constant 0 : i32
    return %c0_i32, %c0_i32_0 : i32, i32
  }
  func.func @transform_2(%arg0: i32) -> (i32, i32) {
    %c0_i32 = arith.constant 0 : i32
    %c0_i32_0 = arith.constant 0 : i32
    %c0_i32_1 = arith.constant 0 : i32
    return %c0_i32, %c0_i32_0 : i32, i32
  }
  func.func @transform_3(%arg0: i32) -> (i32, i32) {
    %c0_i32 = arith.constant 0 : i32
    %c0_i32_0 = arith.constant 0 : i32
    return %c0_i32, %arg0 : i32, i32
  }
}

</mosaic_0001>

<bundles_post_ra>
// kernel: tpu_custom_call.1
= control target key start
LH: loop header
LB: loop body
LE: loop exit
PB: predicated region body
PF: predicated region fallthrough
CT: control target
= control target key end

     0   :  { %vm32_vm0 = vcmask 261120   ;;  %v326_v7 = vmov 0   ;;  %s434_s0 = inlined_call_operand.vmem [shape: f32[8,32], index: 0, kind: input, shape index: {}]   ;;  %s435_s1 = inlined_call_operand.vmem [shape: f32[128,32], index: 1, kind: input, shape index: {}]   ;;  %s436_s2 = inlined_call_operand.vmem [shape: f32[128,1], index: 2, kind: input, shape index: {}]   ;;  %s437_s3 = inlined_call_operand.hbm [shape: f32[2,8], index: 3, kind: output, shape index: {}]  }
   0x1   :  { %v31_v0 = vld [vmem:[%s434_s0] sm:$0xff]  ;;  %v16_v3 = vld [vmem:[%s435_s1 + $0x8] sm:$0xff]  ;;  %v17_v5 = vld [vmem:[%s435_s1 + $0x10] sm:$0xff]  ;;  %301 = vset.pattern.permute.xlu0 %v326_v7 }
   0x2   :  { %v15_v1 = vld [vmem:[%s435_s1] sm:$0xff]  ;;  %271 = vmatprep.subr.msk.mxu0 %vm32_vm0, %v31_v0  ;;  %297 = vmatprep.subr.msk.mxu1 %vm32_vm0, %v31_v0  ;;  %v24_v4 = vld [vmem:[%s435_s1 + $0x48] sm:$0xff]  ;;  %v25_v6 = vld [vmem:[%s435_s1 + $0x50] sm:$0xff] }
   0x3   :  { %v23_v2 = vld [vmem:[%s435_s1 + $0x40] sm:$0xff]  ;;  %272 = vmatpush3.xpose.msk.msra.mxu0 %vm32_vm0, %v31_v0  ;;  %298 = vmatpush3.xpose.msk.msra.mxu1 %vm32_vm0, %v31_v0  ;;  %v18_v9 = vld [vmem:[%s435_s1 + $0x18] sm:$0xff] }
   0x4   :  { %273 = vmatprep.mubr.msk.f32.mxu0 %vm32_vm0, %v15_v1  ;;  %285 = vmatprep.mubr.msk.f32.mxu1 %vm32_vm0, %v23_v2  ;;  %v214_v8 = vld [vmem:[%s436_s2] sm:$0x3]  ;;  %v26_v10 = vld [vmem:[%s435_s1 + $0x58] sm:$0xff] }
   0x6   :  { %274 = vmatmul.mubr.msk.f32.vlgmr.msra.gmra.mrb[0].mxu0 %vm32_vm0, %v16_v3  ;;  %286 = vmatmul.mubr.msk.f32.vlgmr.msra.gmra.mrb[0].mxu1 %vm32_vm0, %v24_v4 }
   0x7   :  { %276 = vmatprep.mubr.msk.f32.mxu0 %vm32_vm0, %v17_v5  ;;  %288 = vmatprep.mubr.msk.f32.mxu1 %vm32_vm0, %v25_v6 }
   0x8   :  { %8 = vsyncpa [#allocation3], 0  ;;  %v19_v11 = vld [vmem:[%s435_s1 + $0x20] sm:$0xff]  ;;  %217 = vperm.xlu0 %301, %v214_v8   ;;  %v20_v13 = vld [vmem:[%s435_s1 + $0x28] sm:$0xff]  ;;  %s327_s19 = smov [#allocation2]   ;;  %vm221_vm1 = vcmask 58368  }
   0x9   :  { %v27_v12 = vld [vmem:[%s435_s1 + $0x60] sm:$0xff]  ;;  %v28_v14 = vld [vmem:[%s435_s1 + $0x68] sm:$0xff]  ;;  %v21_v15 = vld [vmem:[%s435_s1 + $0x30] sm:$0xff]  ;;  %s229_s0 = sshll.u32 %s327_s19, 4  ;;  %s230_s0 = int_to_ptr.vmem [resolvable:$true] %s229_s0 }
   0xa   :  { %277 = vmatmul.mubr.msk.f32.gmra.mrb[2].mxu0 %vm32_vm0, %v18_v9  ;;  %289 = vmatmul.mubr.msk.f32.gmra.mrb[2].mxu1 %vm32_vm0, %v26_v10  ;;  %v29_v16 = vld [vmem:[%s435_s1 + $0x70] sm:$0xff]  ;;  %v22_v17 = vld [vmem:[%s435_s1 + $0x38] sm:$0xff]  ;;  %p307_p1 = scmp.lt.s32.totalorder %s230_s0, %s230_s0 }
   0xb   :  { %279 = vmatprep.mubr.msk.f32.mxu0 %vm32_vm0, %v19_v11  ;;  %291 = vmatprep.mubr.msk.f32.mxu1 %vm32_vm0, %v27_v12  ;;  %v30_v18 = vld [vmem:[%s435_s1 + $0x78] sm:$0xff]  ;;  %s302_s1 = scalar_lea.vmem %s230_s0, 32 }
   0xc   :  { %p303_p0 = scmp.ne.s32.totalorder %s230_s0, %s302_s1  ;;  %p308_p2 = scmp.lt.s32.totalorder %s302_s1, %s302_s1 }
   0xe   :  { %280 = vmatmul.mubr.msk.f32.gmra.mrb[4].mxu0 %vm32_vm0, %v20_v13  ;;  %292 = vmatmul.mubr.msk.f32.gmra.mrb[4].mxu1 %vm32_vm0, %v28_v14  ;;  %p309_p3 = por %p308_p2, %p307_p1 }
   0xf   :  { %282 = vmatprep.mubr.msk.f32.mxu0 %vm32_vm0, %v21_v15  ;;  %294 = vmatprep.mubr.msk.f32.mxu1 %vm32_vm0, %v29_v16 }
  0x10   :  { %p310_p4 = pnand %p309_p3, %p303_p0 }
  0x12   :  { %283 = vmatmul.mubr.msk.f32.gmra.mrb[6].mxu0 %vm32_vm0, %v22_v17  ;;  %295 = vmatmul.mubr.msk.f32.gmra.mrb[6].mxu1 %vm32_vm0, %v30_v18 }
  0x87   :  { %v218_v19 = vpop.permute.xlu0 %217 }
  0xd9   :  { %v275_v20 = vpop.f32.mrb[0].mxu0  ;;  %v287_v21 = vpop.f32.mrb[0].mxu1 }
  0xda   :  { %v150_v22 = vpop.f32.mrb[1].mxu0  ;;  %v183_v23 = vpop.f32.mrb[1].mxu1 }
  0xdb   :  { %v220_v24 = vadd.f32 %v218_v19, %v150_v22 }
  0xdd   :  { %v278_v25 = vpop.f32.mrb[2].mxu0  ;;  %v290_v26 = vpop.f32.mrb[2].mxu1  ;;  %222 = vst.msk [vmem:[#allocation2] sm:$0x3] %vm221_vm1, %v220_v24 }
  0xde   :  { %v159_v27 = vpop.f32.mrb[3].mxu0  ;;  %v191_v28 = vpop.f32.mrb[3].mxu1 }
  0xdf   :  { %313 = shalt.err (!%p310_p4)
}
  0xe0   :  { %s314_s22 = scalar_lea.hbm %s437_s3, 32 }
  0xe1   :  { %p315_p5 = scmp.ne.s32.totalorder %s437_s3, %s314_s22  ;;  %p318_p6 = scmp.lt.u32.totalorder %s314_s22, %s437_s3 }
  0xe3   :  { %p320_p7 = pnand %p318_p6, %p315_p5 }
  0xe5   :  { %323 = shalt.err (!%p320_p7)
}
  0xe6   :  { %232 = dma.vmem_to_hbm [thread:$0]  %s230_s0, 32, %s437_s3, [#allocation3]   ;;  %v281_v29 = vpop.f32.mrb[4].mxu0  ;;  %v293_v30 = vpop.f32.mrb[4].mxu1 }
  0xe7   :  { %v167_v31 = vpop.f32.mrb[5].mxu0  ;;  %v199_v32 = vpop.f32.mrb[5].mxu1 }
  0xe8   :  { %v284_v33 = vpop.f32.mrb[6].mxu0  ;;  %v296_v34 = vpop.f32.mrb[6].mxu1 }
  0xe9   :  { %v175_v35 = vpop.f32.mrb[7].mxu0  ;;  %v207_v36 = vpop.f32.mrb[7].mxu1 }
  0xea   :  { %324 = dma.done.wait [#allocation3], 32  }
  0xeb   :  { %325 = vsyncadd [#allocation3], 4294967264 }
  0xec   :  { %236 = vsyncpa [#allocation3], 1 }

// kernel: tpu_custom_call.1
= control target key start
LH: loop header
LB: loop body
LE: loop exit
PB: predicated region body
PF: predicated region fallthrough
CT: control target
= control target key end

     0   :  { %vm32_vm0 = vcmask 261120   ;;  %v326_v7 = vmov 0   ;;  %s434_s0 = inlined_call_operand.vmem [shape: f32[8,32], index: 0, kind: input, shape index: {}]   ;;  %s435_s1 = inlined_call_operand.vmem [shape: f32[128,32], index: 1, kind: input, shape index: {}]   ;;  %s436_s2 = inlined_call_operand.vmem [shape: f32[128,1], index: 2, kind: input, shape index: {}]   ;;  %s437_s3 = inlined_call_operand.hbm [shape: f32[2,8], index: 3, kind: output, shape index: {}]  }
   0x1   :  { %v31_v0 = vld [vmem:[%s434_s0] sm:$0xff]  ;;  %v16_v3 = vld [vmem:[%s435_s1 + $0x8] sm:$0xff]  ;;  %v17_v5 = vld [vmem:[%s435_s1 + $0x10] sm:$0xff]  ;;  %301 = vset.pattern.permute.xlu0 %v326_v7 }
   0x2   :  { %v15_v1 = vld [vmem:[%s435_s1] sm:$0xff]  ;;  %271 = vmatprep.subr.msk.mxu0 %vm32_vm0, %v31_v0  ;;  %297 = vmatprep.subr.msk.mxu1 %vm32_vm0, %v31_v0  ;;  %v24_v4 = vld [vmem:[%s435_s1 + $0x48] sm:$0xff]  ;;  %v25_v6 = vld [vmem:[%s435_s1 + $0x50] sm:$0xff] }
   0x3   :  { %v23_v2 = vld [vmem:[%s435_s1 + $0x40] sm:$0xff]  ;;  %272 = vmatpush3.xpose.msk.msra.mxu0 %vm32_vm0, %v31_v0  ;;  %298 = vmatpush3.xpose.msk.msra.mxu1 %vm32_vm0, %v31_v0  ;;  %v18_v9 = vld [vmem:[%s435_s1 + $0x18] sm:$0xff] }
   0x4   :  { %273 = vmatprep.mubr.msk.f32.mxu0 %vm32_vm0, %v15_v1  ;;  %285 = vmatprep.mubr.msk.f32.mxu1 %vm32_vm0, %v23_v2  ;;  %v214_v8 = vld [vmem:[%s436_s2] sm:$0x3]  ;;  %v26_v10 = vld [vmem:[%s435_s1 + $0x58] sm:$0xff] }
   0x6   :  { %274 = vmatmul.mubr.msk.f32.vlgmr.msra.gmra.mrb[0].mxu0 %vm32_vm0, %v16_v3  ;;  %286 = vmatmul.mubr.msk.f32.vlgmr.msra.gmra.mrb[0].mxu1 %vm32_vm0, %v24_v4 }
   0x7   :  { %276 = vmatprep.mubr.msk.f32.mxu0 %vm32_vm0, %v17_v5  ;;  %288 = vmatprep.mubr.msk.f32.mxu1 %vm32_vm0, %v25_v6 }
   0x8   :  { %8 = vsyncpa [#allocation3], 0  ;;  %v19_v11 = vld [vmem:[%s435_s1 + $0x20] sm:$0xff]  ;;  %217 = vperm.xlu0 %301, %v214_v8   ;;  %v20_v13 = vld [vmem:[%s435_s1 + $0x28] sm:$0xff]  ;;  %s327_s19 = smov [#allocation2]   ;;  %vm221_vm1 = vcmask 58368  }
   0x9   :  { %v27_v12 = vld [vmem:[%s435_s1 + $0x60] sm:$0xff]  ;;  %v28_v14 = vld [vmem:[%s435_s1 + $0x68] sm:$0xff]  ;;  %v21_v15 = vld [vmem:[%s435_s1 + $0x30] sm:$0xff]  ;;  %s229_s0 = sshll.u32 %s327_s19, 4  ;;  %s230_s0 = int_to_ptr.vmem [resolvable:$true] %s229_s0 }
   0xa   :  { %277 = vmatmul.mubr.msk.f32.gmra.mrb[2].mxu0 %vm32_vm0, %v18_v9  ;;  %289 = vmatmul.mubr.msk.f32.gmra.mrb[2].mxu1 %vm32_vm0, %v26_v10  ;;  %v29_v16 = vld [vmem:[%s435_s1 + $0x70] sm:$0xff]  ;;  %v22_v17 = vld [vmem:[%s435_s1 + $0x38] sm:$0xff]  ;;  %p307_p1 = scmp.lt.s32.totalorder %s230_s0, %s230_s0 }
   0xb   :  { %279 = vmatprep.mubr.msk.f32.mxu0 %vm32_vm0, %v19_v11  ;;  %291 = vmatprep.mubr.msk.f32.mxu1 %vm32_vm0, %v27_v12  ;;  %v30_v18 = vld [vmem:[%s435_s1 + $0x78] sm:$0xff]  ;;  %s302_s1 = scalar_lea.vmem %s230_s0, 32 }
   0xc   :  { %p303_p0 = scmp.ne.s32.totalorder %s230_s0, %s302_s1  ;;  %p308_p2 = scmp.lt.s32.totalorder %s302_s1, %s302_s1 }
   0xe   :  { %280 = vmatmul.mubr.msk.f32.gmra.mrb[4].mxu0 %vm32_vm0, %v20_v13  ;;  %292 = vmatmul.mubr.msk.f32.gmra.mrb[4].mxu1 %vm32_vm0, %v28_v14  ;;  %p309_p3 = por %p308_p2, %p307_p1 }
   0xf   :  { %282 = vmatprep.mubr.msk.f32.mxu0 %vm32_vm0, %v21_v15  ;;  %294 = vmatprep.mubr.msk.f32.mxu1 %vm32_vm0, %v29_v16 }
  0x10   :  { %p310_p4 = pnand %p309_p3, %p303_p0 }
  0x12   :  { %283 = vmatmul.mubr.msk.f32.gmra.mrb[6].mxu0 %vm32_vm0, %v22_v17  ;;  %295 = vmatmul.mubr.msk.f32.gmra.mrb[6].mxu1 %vm32_vm0, %v30_v18 }
  0x87   :  { %v218_v19 = vpop.permute.xlu0 %217 }
  0xd9   :  { %v275_v20 = vpop.f32.mrb[0].mxu0  ;;  %v287_v21 = vpop.f32.mrb[0].mxu1 }
  0xda   :  { %v150_v22 = vpop.f32.mrb[1].mxu0  ;;  %v183_v23 = vpop.f32.mrb[1].mxu1 }
  0xdb   :  { %v220_v24 = vadd.f32 %v218_v19, %v150_v22 }
  0xdd   :  { %v278_v25 = vpop.f32.mrb[2].mxu0  ;;  %v290_v26 = vpop.f32.mrb[2].mxu1  ;;  %222 = vst.msk [vmem:[#allocation2] sm:$0x3] %vm221_vm1, %v220_v24 }
  0xde   :  { %v159_v27 = vpop.f32.mrb[3].mxu0  ;;  %v191_v28 = vpop.f32.mrb[3].mxu1 }
  0xdf   :  { %313 = shalt.err (!%p310_p4)
}
  0xe0   :  { %s314_s22 = scalar_lea.hbm %s437_s3, 32 }
  0xe1   :  { %p315_p5 = scmp.ne.s32.totalorder %s437_s3, %s314_s22  ;;  %p318_p6 = scmp.lt.u32.totalorder %s314_s22, %s437_s3 }
  0xe3   :  { %p320_p7 = pnand %p318_p6, %p315_p5 }
  0xe5   :  { %323 = shalt.err (!%p320_p7)
}
  0xe6   :  { %232 = dma.vmem_to_hbm [thread:$0]  %s230_s0, 32, %s437_s3, [#allocation3]   ;;  %v281_v29 = vpop.f32.mrb[4].mxu0  ;;  %v293_v30 = vpop.f32.mrb[4].mxu1 }
  0xe7   :  { %v167_v31 = vpop.f32.mrb[5].mxu0  ;;  %v199_v32 = vpop.f32.mrb[5].mxu1 }
  0xe8   :  { %v284_v33 = vpop.f32.mrb[6].mxu0  ;;  %v296_v34 = vpop.f32.mrb[6].mxu1 }
  0xe9   :  { %v175_v35 = vpop.f32.mrb[7].mxu0  ;;  %v207_v36 = vpop.f32.mrb[7].mxu1 }
  0xea   :  { %324 = dma.done.wait [#allocation3], 32  }
  0xeb   :  { %325 = vsyncadd [#allocation3], 4294967264 }
  0xec   :  { %236 = vsyncpa [#allocation3], 1 }

</bundles_post_ra>
